<compile_context>
chip_gen: v6e
topology: v6e:2x2x1
jax: 0.10.0
libtpu: 0.0.40
codegen_flags: <defaults>
</compile_context>

<pallas_src>
import jax
import jax.numpy as jnp
from jax.experimental import pallas as pl
from jax.experimental.pallas import tpu as pltpu


def _round_up(x, m):
    return (x + m - 1) // m * m


def _hidden_from_ids(ids_ref, ew1_ref, b1_ref):
    """Fused gather + lin1 + bias + ReLU for one batch tile. Returns (tb, H) f32."""
    tb, C = ids_ref.shape
    CV, H = ew1_ref.shape
    Vin = CV // C                                   # padded input-vocab size (mult of 128)

    ids = ids_ref[...]                              # (tb, C) int32
    lane = jax.lax.broadcasted_iota(jnp.int32, (tb, CV), 1)

    # Stacked one-hot: row b has a single 1 at position ids[b, c] + c*Vin for each context
    # slot c.  C lane-compares + ORs on the VPU; no dynamic gather, no reshape.
    hit = lane == ids[:, 0:1]
    for c in range(1, C):
        hit = hit | (lane == (ids[:, c:c + 1] + c * Vin))
    onehot = hit.astype(ew1_ref.dtype)              # (tb, C*Vin) bf16

    # One MXU matmul: K = C*Vin, N = H.  Selects (exactly) and sums the precomputed
    # per-position rows EW1[c, ids[b,c], :] == emb[ids[b,c]] @ W1_c, i.e. x_flat @ W1.
    hpre = jnp.dot(onehot, ew1_ref[...], preferred_element_type=jnp.float32)
    return jnp.maximum(hpre + b1_ref[...], 0.0)     # bias + ReLU in f32


def _single_tile_kernel(ids_ref, ew1_ref, b1_ref, w2_ref, b2_ref, o_ref):
    """Whole forward for one batch tile when the padded vocab fits one output tile."""
    h = _hidden_from_ids(ids_ref, ew1_ref, b1_ref)                 # (tb, H) f32
    y = jnp.dot(h.astype(w2_ref.dtype), w2_ref[...],
                preferred_element_type=jnp.float32)
    o_ref[...] = y + b2_ref[...]                                   # f32, lane-dense store


def _tiled_vocab_kernel(ids_ref, ew1_ref, b1_ref, w2_ref, b2_ref, o_ref, h_ref):
    """(batch, vocab) grid: hidden computed once per batch tile, cached in f32 scratch."""
    @pl.when(pl.program_id(1) == 0)
    def _():
        h_ref[...] = _hidden_from_ids(ids_ref, ew1_ref, b1_ref)    # f32 cache (no bf16 loss)

    y = jnp.dot(h_ref[...].astype(w2_ref.dtype), w2_ref[...],
                preferred_element_type=jnp.float32)
    o_ref[...] = y + b2_ref[...]


def next_word_forward(x_ids, emb_table, w1, b1, w2, b2, *, block_b=256, block_v=2048):
    """Forward pass equivalent to NextWordModel.forward (ReLU activation)."""
    B, C = x_ids.shape
    V, E = emb_table.shape
    D_in = C * E
    H = w1.shape[1]
    assert w1.shape == (D_in, H) and b1.shape == (H,)
    assert w2.shape == (H, V) and b2.shape == (V,)

    # Batch tile: multiple of 8 (sublanes); vocab tile: multiple of 128 (lane-dense out).
    tb = min(_round_up(B, 8), _round_up(block_b, 8))
    tv = min(_round_up(V, 128), _round_up(block_v, 128))
    Bp = _round_up(B, tb)
    Vp = _round_up(V, tv)
    Vin = _round_up(V, 128)            # padded vocab used as the one-hot contraction dim

    # ----- wrapper-side operand prep (weight-only precompute, cacheable across calls) -----
    ids_p = jnp.pad(x_ids.astype(jnp.int32), ((0, Bp - B), (0, 0)))
    # EW1[c] = emb @ W1[c*E:(c+1)*E, :]  -> folds gather + lin1 into a single K=C*Vin matmul.
    ew1 = jnp.einsum('ve,ceh->cvh', emb_table.astype(jnp.float32),
                     w1.reshape(C, E, H).astype(jnp.float32))          # (C, V, H) f32
    ew1 = jnp.pad(ew1, ((0, 0), (0, Vin - V), (0, 0)))
    ew1 = ew1.reshape(C * Vin, H).astype(jnp.bfloat16)                 # (C*Vin, H) bf16
    b1_2 = b1.reshape(1, H).astype(jnp.float32)
    w2_p = jnp.pad(w2, ((0, 0), (0, Vp - V))).astype(jnp.bfloat16)     # (H, Vp) bf16
    b2_2 = jnp.pad(b2, (0, Vp - V)).reshape(1, Vp).astype(jnp.float32)

    n_b, n_v = Bp // tb, Vp // tv
    flops = 2 * Bp * (C * Vin * H + H * Vp)
    bytes_accessed = (Bp * C * 4 + C * Vin * H * 2 + H * 4
                      + H * Vp * 2 + Vp * 4 + Bp * Vp * 4)
    cost = pl.CostEstimate(flops=flops, transcendentals=0, bytes_accessed=bytes_accessed)

    if n_v == 1:
        # Single vocab tile (demo / small vocab): no vocab grid axis, no scratch, no pl.when.
        out = pl.pallas_call(
            _single_tile_kernel,
            out_shape=jax.ShapeDtypeStruct((Bp, Vp), jnp.float32),
            grid_spec=pltpu.PrefetchScalarGridSpec(
                num_scalar_prefetch=0,
                grid=(n_b,),
                in_specs=[
                    pl.BlockSpec((tb, C), lambda i: (i, 0)),         # token ids
                    pl.BlockSpec((C * Vin, H), lambda i: (0, 0)),    # EW1
                    pl.BlockSpec((1, H), lambda i: (0, 0)),          # b1
                    pl.BlockSpec((H, Vp), lambda i: (0, 0)),         # W2
                    pl.BlockSpec((1, Vp), lambda i: (0, 0)),         # b2
                ],
                out_specs=pl.BlockSpec((tb, Vp), lambda i: (i, 0)),
            ),
            compiler_params=pltpu.CompilerParams(
                dimension_semantics=("parallel",)),                  # batch tiles independent
            cost_estimate=cost,
        )(ids_p, ew1, b1_2, w2_p, b2_2)
    else:
        out = pl.pallas_call(
            _tiled_vocab_kernel,
            out_shape=jax.ShapeDtypeStruct((Bp, Vp), jnp.float32),
            grid_spec=pltpu.PrefetchScalarGridSpec(
                num_scalar_prefetch=0,
                grid=(n_b, n_v),
                in_specs=[
                    pl.BlockSpec((tb, C), lambda i, j: (i, 0)),      # token ids
                    pl.BlockSpec((C * Vin, H), lambda i, j: (0, 0)), # EW1
                    pl.BlockSpec((1, H), lambda i, j: (0, 0)),       # b1
                    pl.BlockSpec((H, tv), lambda i, j: (0, j)),      # W2 vocab tile
                    pl.BlockSpec((1, tv), lambda i, j: (0, j)),      # b2 vocab tile
                ],
                out_specs=pl.BlockSpec((tb, tv), lambda i, j: (i, j)),
                scratch_shapes=[pltpu.VMEM((tb, H), jnp.float32)],   # f32 hidden cache
            ),
            compiler_params=pltpu.CompilerParams(
                # vocab axis must stay 'arbitrary': the hidden scratch written at j == 0
                # is reused by later vocab tiles of the same batch tile.
                dimension_semantics=("parallel", "arbitrary")),
            cost_estimate=cost,
        )(ids_p, ew1, b1_2, w2_p, b2_2)

    return out[:B, :V]


if __name__ == "__main__":
    def reference(x_ids, emb_table, w1, b1, w2, b2):
        x_emb = jnp.take(emb_table, x_ids, axis=0).reshape(x_ids.shape[0], -1)
        return jnp.maximum(x_emb @ w1 + b1, 0.0) @ w2 + b2

    def make_inputs(key, vocab_size, emb_dim, context_len, hidden, batch):
        ks = jax.random.split(key, 6)
        emb = jax.random.normal(ks[0], (vocab_size, emb_dim), jnp.float32) * 0.1
        # (in_features, out_features) == PyTorch weight.T
        w1 = jax.random.normal(ks[1], (context_len * emb_dim, hidden), jnp.float32) * 0.05
        b1 = jax.random.normal(ks[2], (hidden,), jnp.float32) * 0.01
        w2 = jax.random.normal(ks[3], (hidden, vocab_size), jnp.float32) * 0.05
        b2 = jax.random.normal(ks[4], (vocab_size,), jnp.float32) * 0.01
        ids = jax.random.randint(ks[5], (batch, context_len), 0, vocab_size, jnp.int32)
        return ids, emb, w1, b1, w2, b2

    key = jax.random.PRNGKey(0)
    k1, k2 = jax.random.split(key)

    # Config 1: module-like small config (hidden=256 fixed by the module) -> single-tile path.
    args1 = make_inputs(k1, vocab_size=64, emb_dim=32, context_len=4, hidden=256, batch=8)
    out1 = jax.block_until_ready(jax.jit(next_word_forward)(*args1))
    ref1 = reference(*args1)
    assert out1.shape == ref1.shape == (8, 64)
    assert jnp.allclose(out1, ref1, atol=2e-2, rtol=2e-2), "mismatch (single-tile path)"

    # Config 2: small block_v forces the tiled-vocab path (3 vocab tiles) at small scale.
    args2 = make_inputs(k2, vocab_size=320, emb_dim=32, context_len=4, hidden=256, batch=16)
    fwd2 = jax.jit(lambda *a: next_word_forward(*a, block_v=128))
    out2 = jax.block_until_ready(fwd2(*args2))
    ref2 = reference(*args2)
    assert out2.shape == ref2.shape == (16, 320)
    assert jnp.allclose(out2, ref2, atol=2e-2, rtol=2e-2), "mismatch (tiled-vocab path)"

    print("KERNEL_OK")
</pallas_src>

<mosaic_0001>
module attributes {stable_mosaic.version = 11 : i64} {
  func.func @_single_tile_kernel(%arg0: i32, %arg1: memref<8x4xi32, #tpu.memory_space<vmem>>, %arg2: memref<512x256xbf16, #tpu.memory_space<vmem>>, %arg3: memref<1x256xf32, #tpu.memory_space<vmem>>, %arg4: memref<256x128xbf16, #tpu.memory_space<vmem>>, %arg5: memref<1x128xf32, #tpu.memory_space<vmem>>, %arg6: memref<8x128xf32, #tpu.memory_space<vmem>>) attributes {dimension_semantics = [#tpu.dimension_semantics<parallel>], iteration_bounds = array<i64: 1>, scalar_prefetch = 0 : i64, scratch_operands = 0 : i64, tpu.core_type = #tpu.core_type<tc>, window_params = [{transform_indices = @transform_0, window_bounds = array<i64: 8, 4>}, {pipeline_mode = #tpu.pipeline_mode<synchronous>, transform_indices = @transform_1, window_bounds = array<i64: 512, 256>}, {pipeline_mode = #tpu.pipeline_mode<synchronous>, transform_indices = @transform_2, window_bounds = array<i64: 1, 256>}, {pipeline_mode = #tpu.pipeline_mode<synchronous>, transform_indices = @transform_3, window_bounds = array<i64: 256, 128>}, {pipeline_mode = #tpu.pipeline_mode<synchronous>, transform_indices = @transform_4, window_bounds = array<i64: 1, 128>}, {transform_indices = @transform_5, window_bounds = array<i64: 8, 128>}]} {
    %c0 = arith.constant 0 : index
    %c0_0 = arith.constant 0 : index
    %0 = vector.load %arg1[%c0, %c0_0] : memref<8x4xi32, #tpu.memory_space<vmem>>, vector<8x4xi32>
    %1 = tpu.iota {dimensions = array<i32: 1>} : vector<8x512xi32>
    %2 = vector.extract_strided_slice %0 {offsets = [0, 0], sizes = [8, 1], strides = [1, 1]} : vector<8x4xi32> to vector<8x1xi32>
    %3 = vector.broadcast %2 : vector<8x1xi32> to vector<8x512xi32>
    %4 = arith.cmpi eq, %1, %3 : vector<8x512xi32>
    %5 = vector.extract_strided_slice %0 {offsets = [0, 1], sizes = [8, 1], strides = [1, 1]} : vector<8x4xi32> to vector<8x1xi32>
    %c128_i32 = arith.constant 128 : i32
    %6 = vector.broadcast %c128_i32 : i32 to vector<8x1xi32>
    %7 = arith.addi %5, %6 : vector<8x1xi32>
    %8 = vector.broadcast %7 : vector<8x1xi32> to vector<8x512xi32>
    %9 = arith.cmpi eq, %1, %8 : vector<8x512xi32>
    %10 = arith.ori %4, %9 : vector<8x512xi1>
    %11 = vector.extract_strided_slice %0 {offsets = [0, 2], sizes = [8, 1], strides = [1, 1]} : vector<8x4xi32> to vector<8x1xi32>
    %c256_i32 = arith.constant 256 : i32
    %12 = vector.broadcast %c256_i32 : i32 to vector<8x1xi32>
    %13 = arith.addi %11, %12 : vector<8x1xi32>
    %14 = vector.broadcast %13 : vector<8x1xi32> to vector<8x512xi32>
    %15 = arith.cmpi eq, %1, %14 : vector<8x512xi32>
    %16 = arith.ori %10, %15 : vector<8x512xi1>
    %17 = vector.extract_strided_slice %0 {offsets = [0, 3], sizes = [8, 1], strides = [1, 1]} : vector<8x4xi32> to vector<8x1xi32>
    %c384_i32 = arith.constant 384 : i32
    %18 = vector.broadcast %c384_i32 : i32 to vector<8x1xi32>
    %19 = arith.addi %17, %18 : vector<8x1xi32>
    %20 = vector.broadcast %19 : vector<8x1xi32> to vector<8x512xi32>
    %21 = arith.cmpi eq, %1, %20 : vector<8x512xi32>
    %22 = arith.ori %16, %21 : vector<8x512xi1>
    %23 = arith.extui %22 : vector<8x512xi1> to vector<8x512xi32>
    %24 = arith.sitofp %23 : vector<8x512xi32> to vector<8x512xf32>
    %25 = arith.truncf %24 : vector<8x512xf32> to vector<8x512xbf16>
    %c0_1 = arith.constant 0 : index
    %c0_2 = arith.constant 0 : index
    %26 = vector.load %arg2[%c0_1, %c0_2] : memref<512x256xbf16, #tpu.memory_space<vmem>>, vector<512x256xbf16>
    %cst = arith.constant dense<0.000000e+00> : vector<8x256xf32>
    %27 = tpu.matmul %25, %26, %cst {dimension_numbers = #tpu.dot_dimension_numbers<[1], [0], [0], [1], [0, 0, 1, 1], [], []>} : vector<8x512xbf16>, vector<512x256xbf16>, vector<8x256xf32> -> vector<8x256xf32>
    %c0_3 = arith.constant 0 : index
    %c0_4 = arith.constant 0 : index
    %28 = vector.load %arg3[%c0_3, %c0_4] : memref<1x256xf32, #tpu.memory_space<vmem>>, vector<1x256xf32>
    %29 = vector.broadcast %28 : vector<1x256xf32> to vector<8x256xf32>
    %30 = arith.addf %27, %29 : vector<8x256xf32>
    %cst_5 = arith.constant 0.000000e+00 : f32
    %31 = vector.broadcast %cst_5 : f32 to vector<8x256xf32>
    %32 = arith.maximumf %30, %31 : vector<8x256xf32>
    %33 = arith.truncf %32 : vector<8x256xf32> to vector<8x256xbf16>
    %c0_6 = arith.constant 0 : index
    %c0_7 = arith.constant 0 : index
    %34 = vector.load %arg4[%c0_6, %c0_7] : memref<256x128xbf16, #tpu.memory_space<vmem>>, vector<256x128xbf16>
    %cst_8 = arith.constant dense<0.000000e+00> : vector<8x128xf32>
    %35 = tpu.matmul %33, %34, %cst_8 {dimension_numbers = #tpu.dot_dimension_numbers<[1], [0], [0], [1], [0, 0, 1, 1], [], []>} : vector<8x256xbf16>, vector<256x128xbf16>, vector<8x128xf32> -> vector<8x128xf32>
    %c0_9 = arith.constant 0 : index
    %c0_10 = arith.constant 0 : index
    %36 = vector.load %arg5[%c0_9, %c0_10] : memref<1x128xf32, #tpu.memory_space<vmem>>, vector<1x128xf32>
    %37 = vector.broadcast %36 : vector<1x128xf32> to vector<8x128xf32>
    %38 = arith.addf %35, %37 : vector<8x128xf32>
    %c0_11 = arith.constant 0 : index
    %c0_12 = arith.constant 0 : index
    %39 = vector.load %arg6[%c0_11, %c0_12] : memref<8x128xf32, #tpu.memory_space<vmem>>, vector<8x128xf32>
    tpu.vector_store %arg6[%c0_11, %c0_12], %38 {strides = array<i32>} : memref<8x128xf32, #tpu.memory_space<vmem>>, vector<8x128xf32>,
    return
  }
  func.func @transform_0(%arg0: i32) -> (i32, i32) {
    %c0_i32 = arith.constant 0 : i32
    %c0_i32_0 = arith.constant 0 : i32
    return %arg0, %c0_i32 : i32, i32
  }
  func.func @transform_1(%arg0: i32) -> (i32, i32) {
    %c0_i32 = arith.constant 0 : i32
    %c0_i32_0 = arith.constant 0 : i32
    %c0_i32_1 = arith.constant 0 : i32
    return %c0_i32, %c0_i32_0 : i32, i32
  }
  func.func @transform_2(%arg0: i32) -> (i32, i32) {
    %c0_i32 = arith.constant 0 : i32
    %c0_i32_0 = arith.constant 0 : i32
    %c0_i32_1 = arith.constant 0 : i32
    return %c0_i32, %c0_i32_0 : i32, i32
  }
  func.func @transform_3(%arg0: i32) -> (i32, i32) {
    %c0_i32 = arith.constant 0 : i32
    %c0_i32_0 = arith.constant 0 : i32
    %c0_i32_1 = arith.constant 0 : i32
    return %c0_i32, %c0_i32_0 : i32, i32
  }
  func.func @transform_4(%arg0: i32) -> (i32, i32) {
    %c0_i32 = arith.constant 0 : i32
    %c0_i32_0 = arith.constant 0 : i32
    %c0_i32_1 = arith.constant 0 : i32
    return %c0_i32, %c0_i32_0 : i32, i32
  }
  func.func @transform_5(%arg0: i32) -> (i32, i32) {
    %c0_i32 = arith.constant 0 : i32
    %c0_i32_0 = arith.constant 0 : i32
    return %arg0, %c0_i32 : i32, i32
  }
}

</mosaic_0001>

<bundles_post_ra>
// kernel: next_word_forward.1
= control target key start
LH: loop header
LB: loop body
LE: loop exit
PB: predicated region body
PF: predicated region fallthrough
CT: control target
= control target key end

     0   :  { %v1015_v1 = vmov 0   ;;  %v1016_v2 = vmov 2   ;;  %v1017_v13 = vmov 1   ;;  %v1018_v15 = vmov 3   ;;  %s1317_s0 = inlined_call_operand.vmem [shape: s32[8,4], index: 0, kind: input, shape index: {}]   ;;  %s1318_s1 = inlined_call_operand.vmem [shape: bf16[512,256], index: 1, kind: input, shape index: {}]   ;;  %s1319_s2 = inlined_call_operand.vmem [shape: f32[1,256], index: 2, kind: input, shape index: {}]   ;;  %s1320_s3 = inlined_call_operand.vmem [shape: bf16[256,128], index: 3, kind: input, shape index: {}]   ;;  %s1321_s4 = inlined_call_operand.vmem [shape: f32[1,128], index: 4, kind: input, shape index: {}]   ;;  %s1322_s5 = inlined_call_operand.hbm [shape: f32[8,128], index: 5, kind: output, shape index: {}]  }
   0x1   :  { %v22_v0 = vld [vmem:[%s1317_s0] sm:$0xff]  ;;  %876 = vset.pattern.permute.xlu0 %v1015_v1  ;;  %878 = vset.pattern.permute.xlu1 %v1016_v2  ;;  %v881_v4 = vld [vmem:[%s1318_s1 + $0x74] ss:$8 sps:$4 sm:$0xff]   ;;  %v885_v7 = vld [vmem:[%s1318_s1 + $0x70] ss:$8 sps:$4 sm:$0xff]  }
   0x2   :  { %v47_v3 = vadd.s32 256, %v22_v0  ;;  %29 = vperm.xlu0 %876, %v22_v0   ;;  %v883_v5 = vld [vmem:[%s1318_s1 + $0x174] ss:$8 sps:$4 sm:$0xff]   ;;  %v35_v6 = vadd.s32 128, %v22_v0  ;;  %479 = vmatprep.subr.bf16.mxu0 %v881_v4  ;;  %v886_v8 = vld [vmem:[%s1318_s1 + $0x170] ss:$8 sps:$4 sm:$0xff]  }
   0x3   :  { %v59_v9 = vadd.s32 384, %v22_v0  ;;  %520 = vmatprep.subr.bf16.mxu1 %v883_v5  ;;  %v887_v10 = vld [vmem:[%s1318_s1 + $0x64] ss:$8 sps:$4 sm:$0xff]   ;;  %480 = vmatpush1.bf16.msra.mxu0 %v885_v7  ;;  %v891_v12 = vld [vmem:[%s1318_s1 + $0x60] ss:$8 sps:$4 sm:$0xff]  }
   0x4   :  { %49 = vperm.xlu1 %878, %v47_v3   ;;  %521 = vmatpush1.bf16.msra.mxu1 %v886_v8  ;;  %v889_v11 = vld [vmem:[%s1318_s1 + $0x164] ss:$8 sps:$4 sm:$0xff]   ;;  %v892_v14 = vld [vmem:[%s1318_s1 + $0x160] ss:$8 sps:$4 sm:$0xff]   ;;  %v893_v16 = vld [vmem:[%s1318_s1 + $0x54] ss:$8 sps:$4 sm:$0xff]  }
   0x5   :  { %481 = vmatprep.subr.bf16.mxu0 %v887_v10  ;;  %522 = vmatprep.subr.bf16.mxu1 %v889_v11  ;;  %v895_v17 = vld [vmem:[%s1318_s1 + $0x154] ss:$8 sps:$4 sm:$0xff]   ;;  %v897_v18 = vld [vmem:[%s1318_s1 + $0x50] ss:$8 sps:$4 sm:$0xff]   ;;  %v899_v20 = vld [vmem:[%s1318_s1 + $0x44] ss:$8 sps:$4 sm:$0xff]  }
   0x6   :  { %877 = vset.pattern.permute.xlu0 %v1017_v13  ;;  %v898_v19 = vld [vmem:[%s1318_s1 + $0x150] ss:$8 sps:$4 sm:$0xff]   ;;  %v901_v21 = vld [vmem:[%s1318_s1 + $0x144] ss:$8 sps:$4 sm:$0xff]   ;;  %v903_v22 = vld [vmem:[%s1318_s1 + $0x40] ss:$8 sps:$4 sm:$0xff]  }
   0x7   :  { %37 = vperm.xlu0 %877, %v35_v6   ;;  %482 = vmatpush1.bf16.msra.mxu0 %v891_v12  ;;  %v904_v23 = vld [vmem:[%s1318_s1 + $0x140] ss:$8 sps:$4 sm:$0xff]   ;;  %v905_v24 = vld [vmem:[%s1318_s1 + $0x34] ss:$8 sps:$4 sm:$0xff]   ;;  %v909_v26 = vld [vmem:[%s1318_s1 + $0x30] ss:$8 sps:$4 sm:$0xff]  }
   0x8   :  { %879 = vset.pattern.permute.xlu1 %v1018_v15  ;;  %523 = vmatpush1.bf16.msra.mxu1 %v892_v14  ;;  %v907_v25 = vld [vmem:[%s1318_s1 + $0x134] ss:$8 sps:$4 sm:$0xff]   ;;  %v910_v27 = vld [vmem:[%s1318_s1 + $0x130] ss:$8 sps:$4 sm:$0xff]   ;;  %v911_v28 = vld [vmem:[%s1318_s1 + $0x24] ss:$8 sps:$4 sm:$0xff]  }
   0x9   :  { %61 = vperm.xlu1 %879, %v59_v9   ;;  %483 = vmatprep.subr.bf16.mxu0 %v893_v16  ;;  %v913_v29 = vld [vmem:[%s1318_s1 + $0x124] ss:$8 sps:$4 sm:$0xff]   ;;  %v915_v30 = vld [vmem:[%s1318_s1 + $0x20] ss:$8 sps:$4 sm:$0xff]   ;;  %v917_v32 = vld [vmem:[%s1318_s1 + $0x14] ss:$8 sps:$4 sm:$0xff]  }
   0xa   :  { %524 = vmatprep.subr.bf16.mxu1 %v895_v17  ;;  %v916_v31 = vld [vmem:[%s1318_s1 + $0x120] ss:$8 sps:$4 sm:$0xff]   ;;  %v919_v33 = vld [vmem:[%s1318_s1 + $0x114] ss:$8 sps:$4 sm:$0xff]   ;;  %v921_v34 = vld [vmem:[%s1318_s1 + $0x10] ss:$8 sps:$4 sm:$0xff]  }
   0xb   :  { %880 = vset.pattern.permute.xlu0 %v1018_v15  ;;  %484 = vmatpush1.bf16.msra.mxu0 %v897_v18  ;;  %v922_v35 = vld [vmem:[%s1318_s1 + $0x110] ss:$8 sps:$4 sm:$0xff]   ;;  %v923_v36 = vld [vmem:[%s1318_s1 + $0x4] ss:$8 sps:$4 sm:$0xff]   ;;  %v927_v38 = vld [vmem:[%s1318_s1] ss:$8 sps:$4 sm:$0xff]  }
   0xc   :  { %525 = vmatpush1.bf16.msra.mxu1 %v898_v19  ;;  %485 = vmatprep.subr.bf16.mxu0 %v899_v20  ;;  %v925_v37 = vld [vmem:[%s1318_s1 + $0x104] ss:$8 sps:$4 sm:$0xff]   ;;  %v928_v39 = vld [vmem:[%s1318_s1 + $0x100] ss:$8 sps:$4 sm:$0xff]   ;;  %v929_v40 = vld [vmem:[%s1318_s1 + $0xf4] ss:$8 sps:$4 sm:$0xff]  }
   0xd   :  { %526 = vmatprep.subr.bf16.mxu1 %v901_v21  ;;  %v931_v41 = vld [vmem:[%s1318_s1 + $0x1f4] ss:$8 sps:$4 sm:$0xff]   ;;  %v933_v42 = vld [vmem:[%s1318_s1 + $0xf0] ss:$8 sps:$4 sm:$0xff]   ;;  %v935_v44 = vld [vmem:[%s1318_s1 + $0xe4] ss:$8 sps:$4 sm:$0xff]  }
   0xe   :  { %v934_v43 = vld [vmem:[%s1318_s1 + $0x1f0] ss:$8 sps:$4 sm:$0xff]   ;;  %v937_v45 = vld [vmem:[%s1318_s1 + $0x1e4] ss:$8 sps:$4 sm:$0xff]   ;;  %v939_v46 = vld [vmem:[%s1318_s1 + $0xe0] ss:$8 sps:$4 sm:$0xff]  }
   0xf   :  { %486 = vmatpush1.bf16.msra.mxu0 %v903_v22  ;;  %v940_v47 = vld [vmem:[%s1318_s1 + $0x1e0] ss:$8 sps:$4 sm:$0xff]   ;;  %v941_v48 = vld [vmem:[%s1318_s1 + $0xd4] ss:$8 sps:$4 sm:$0xff]   ;;  %v945_v50 = vld [vmem:[%s1318_s1 + $0xd0] ss:$8 sps:$4 sm:$0xff]  }
  0x10   :  { %527 = vmatpush1.bf16.msra.mxu1 %v904_v23  ;;  %487 = vmatprep.subr.bf16.mxu0 %v905_v24  ;;  %v943_v49 = vld [vmem:[%s1318_s1 + $0x1d4] ss:$8 sps:$4 sm:$0xff]   ;;  %v946_v51 = vld [vmem:[%s1318_s1 + $0x1d0] ss:$8 sps:$4 sm:$0xff]   ;;  %v947_v52 = vld [vmem:[%s1318_s1 + $0xc4] ss:$8 sps:$4 sm:$0xff]  }
  0x11   :  { %528 = vmatprep.subr.bf16.mxu1 %v907_v25  ;;  %v949_v53 = vld [vmem:[%s1318_s1 + $0x1c4] ss:$8 sps:$4 sm:$0xff]   ;;  %v951_v54 = vld [vmem:[%s1318_s1 + $0xc0] ss:$8 sps:$4 sm:$0xff]   ;;  %v953_v56 = vld [vmem:[%s1318_s1 + $0xb4] ss:$8 sps:$4 sm:$0xff]  }
  0x12   :  { %v952_v55 = vld [vmem:[%s1318_s1 + $0x1c0] ss:$8 sps:$4 sm:$0xff]   ;;  %v955_v57 = vld [vmem:[%s1318_s1 + $0x1b4] ss:$8 sps:$4 sm:$0xff]   ;;  %v957_v58 = vld [vmem:[%s1318_s1 + $0xb0] ss:$8 sps:$4 sm:$0xff]  }
  0x13   :  { %488 = vmatpush1.bf16.msra.mxu0 %v909_v26  ;;  %v958_v59 = vld [vmem:[%s1318_s1 + $0x1b0] ss:$8 sps:$4 sm:$0xff]   ;;  %v959_v60 = vld [vmem:[%s1318_s1 + $0xa4] ss:$8 sps:$4 sm:$0xff]   ;;  %v963_v62 = vld [vmem:[%s1318_s1 + $0xa0] ss:$8 sps:$4 sm:$0xff]  }
  0x14   :  { %529 = vmatpush1.bf16.msra.mxu1 %v910_v27  ;;  %489 = vmatprep.subr.bf16.mxu0 %v911_v28  ;;  %v961_v61 = vld [vmem:[%s1318_s1 + $0x1a4] ss:$8 sps:$4 sm:$0xff]   ;;  %v964_v63 = vld [vmem:[%s1318_s1 + $0x1a0] ss:$8 sps:$4 sm:$0xff]   ;;  %v965_v0 = vld [vmem:[%s1318_s1 + $0x94] ss:$8 sps:$4 sm:$0xff]  }
  0x15   :  { %530 = vmatprep.subr.bf16.mxu1 %v913_v29  ;;  %v967_v1 = vld [vmem:[%s1318_s1 + $0x194] ss:$8 sps:$4 sm:$0xff]   ;;  %v969_v2 = vld [vmem:[%s1318_s1 + $0x90] ss:$8 sps:$4 sm:$0xff]   ;;  %v971_v4 = vld [vmem:[%s1318_s1 + $0x84] ss:$8 sps:$4 sm:$0xff]  }
  0x16   :  { %v970_v3 = vld [vmem:[%s1318_s1 + $0x190] ss:$8 sps:$4 sm:$0xff]   ;;  %v973_v5 = vld [vmem:[%s1318_s1 + $0x184] ss:$8 sps:$4 sm:$0xff]  }
  0x17   :  { %490 = vmatpush1.bf16.msra.mxu0 %v915_v30 }
  0x18   :  { %531 = vmatpush1.bf16.msra.mxu1 %v916_v31  ;;  %491 = vmatprep.subr.bf16.mxu0 %v917_v32 }
  0x19   :  { %532 = vmatprep.subr.bf16.mxu1 %v919_v33 }
  0x1b   :  { %492 = vmatpush1.bf16.msra.mxu0 %v921_v34 }
  0x1c   :  { %533 = vmatpush1.bf16.msra.mxu1 %v922_v35  ;;  %493 = vmatprep.subr.bf16.mxu0 %v923_v36 }
  0x1d   :  { %534 = vmatprep.subr.bf16.mxu1 %v925_v37 }
  0x1f   :  { %494 = vmatpush1.bf16.msra.mxu0 %v927_v38 }
  0x20   :  { %535 = vmatpush1.bf16.msra.mxu1 %v928_v39  ;;  %495 = vmatprep.subr.bf16.mxu0 %v929_v40 }
  0x21   :  { %536 = vmatprep.subr.bf16.mxu1 %v931_v41 }
  0x23   :  { %496 = vmatpush2.bf16.msra.mxu0 %v933_v42 }
  0x24   :  { %537 = vmatpush2.bf16.msra.mxu1 %v934_v43  ;;  %497 = vmatprep.subr.bf16.mxu0 %v935_v44 }
  0x25   :  { %538 = vmatprep.subr.bf16.mxu1 %v937_v45 }
  0x27   :  { %498 = vmatpush2.bf16.msra.mxu0 %v939_v46 }
  0x28   :  { %539 = vmatpush2.bf16.msra.mxu1 %v940_v47  ;;  %499 = vmatprep.subr.bf16.mxu0 %v941_v48 }
  0x29   :  { %540 = vmatprep.subr.bf16.mxu1 %v943_v49 }
  0x2b   :  { %500 = vmatpush2.bf16.msra.mxu0 %v945_v50 }
  0x2c   :  { %541 = vmatpush2.bf16.msra.mxu1 %v946_v51  ;;  %501 = vmatprep.subr.bf16.mxu0 %v947_v52 }
  0x2d   :  { %542 = vmatprep.subr.bf16.mxu1 %v949_v53 }
  0x2f   :  { %502 = vmatpush2.bf16.msra.mxu0 %v951_v54 }
  0x30   :  { %543 = vmatpush2.bf16.msra.mxu1 %v952_v55  ;;  %503 = vmatprep.subr.bf16.mxu0 %v953_v56 }
  0x31   :  { %544 = vmatprep.subr.bf16.mxu1 %v955_v57 }
  0x33   :  { %504 = vmatpush2.bf16.msra.mxu0 %v957_v58 }
  0x34   :  { %545 = vmatpush2.bf16.msra.mxu1 %v958_v59  ;;  %505 = vmatprep.subr.bf16.mxu0 %v959_v60 }
  0x35   :  { %546 = vmatprep.subr.bf16.mxu1 %v961_v61 }
  0x37   :  { %506 = vmatpush2.bf16.msra.mxu0 %v963_v62 }
  0x38   :  { %547 = vmatpush2.bf16.msra.mxu1 %v964_v63  ;;  %507 = vmatprep.subr.bf16.mxu0 %v965_v0 }
  0x39   :  { %548 = vmatprep.subr.bf16.mxu1 %v967_v1 }
  0x3a   :  { %10 = vsyncpa [#allocation3], 0  ;;  %v975_v6 = vld [vmem:[%s1318_s1 + $0x80] ss:$8 sps:$4 sm:$0xff]   ;;  %v977_v8 = vld [vmem:[%s1320_s3 + $0x78] sm:$0xff]   ;;  %v23_v9 = vlaneseq  ;;  %v1323_v18 = vmov 0 }
  0x3b   :  { %508 = vmatpush2.bf16.msra.mxu0 %v969_v2  ;;  %v976_v7 = vld [vmem:[%s1318_s1 + $0x180] ss:$8 sps:$4 sm:$0xff]   ;;  %v1325_v19 = vmov 0  ;;  %v1019_v20 = vmov 1.0|1.0   ;;  %v978_v21 = vld [vmem:[%s1320_s3 + $0x38] sm:$0xff]  }
  0x3c   :  { %549 = vmatpush2.bf16.msra.mxu1 %v970_v3  ;;  %509 = vmatprep.subr.bf16.mxu0 %v971_v4  ;;  %v24_v11 = vand.u32 127, %v23_v9  ;;  %v979_v22 = vld [vmem:[%s1320_s3 + $0x70] sm:$0xff]   ;;  %v981_v24 = vld [vmem:[%s1320_s3 + $0x68] sm:$0xff]   ;;  %v983_v26 = vld [vmem:[%s1320_s3 + $0x60] sm:$0xff]   ;;  %v150_v36 = vshrl.u32 %v23_v9, 7  ;;  %s1020_s24 = smov [#allocation2]  }
  0x3d   :  { %550 = vmatprep.subr.bf16.mxu1 %v973_v5  ;;  %v980_v23 = vld [vmem:[%s1320_s3 + $0x30] sm:$0xff]   ;;  %v982_v25 = vld [vmem:[%s1320_s3 + $0x28] sm:$0xff]   ;;  %v984_v27 = vld [vmem:[%s1320_s3 + $0x20] sm:$0xff]   ;;  %s747_s25 = sshll.u32 %s1020_s24, 4  ;;  %s748_s25 = int_to_ptr.vmem [resolvable:$true] %s747_s25 }
  0x3e   :  { %v25_v13 = vadd.s32 128, %v24_v11  ;;  %v26_v14 = vadd.s32 256, %v24_v11  ;;  %v27_v17 = vadd.s32 384, %v24_v11  ;;  %v985_v28 = vld [vmem:[%s1320_s3 + $0x58] sm:$0xff]   ;;  %v987_v30 = vld [vmem:[%s1320_s3 + $0x50] sm:$0xff]   ;;  %v989_v32 = vld [vmem:[%s1320_s3 + $0x48] sm:$0xff]   ;;  %p998_p1 = scmp.lt.s32.totalorder %s748_s25, %s748_s25 }
  0x3f   :  { %510 = vmatpush2.bf16.msra.mxu0 %v975_v6  ;;  %v986_v29 = vld [vmem:[%s1320_s3 + $0x18] sm:$0xff]   ;;  %v988_v31 = vld [vmem:[%s1320_s3 + $0x10] sm:$0xff]   ;;  %v990_v33 = vld [vmem:[%s1320_s3 + $0x8] sm:$0xff]   ;;  %v151_v37 = vsub.s32 0, %v150_v36  ;;  %v155_v39 = vsub.s32 1, %v150_v36  ;;  %s993_s0 = scalar_lea.vmem %s748_s25, 128 }
  0x40   :  { %551 = vmatpush2.bf16.msra.mxu1 %v976_v7  ;;  %848 = vmatprep.subr.bf16.mxu0 %v977_v8  ;;  %v991_v34 = vld [vmem:[%s1320_s3 + $0x40] sm:$0xff]   ;;  %p994_p0 = scmp.ne.s32.totalorder %s748_s25, %s993_s0  ;;  %p999_p2 = scmp.lt.s32.totalorder %s993_s0, %s993_s0 }
  0x41   :  { %v992_v35 = vld [vmem:[%s1320_s3] sm:$0xff]  }
  0x42   :  { %v147_v38 = vld [vmem:[%s1319_s2] sm:$0x3]  ;;  %p1000_p3 = por %p999_p2, %p998_p1 }
  0x43   :  { %v152_v40 = vrot.slane %v147_v38, %v151_v37  ;;  %v156_v41 = vrot.slane %v147_v38, %v155_v39  ;;  %v831_v60 = vld [vmem:[%s1321_s4] ss:$0 sm:$0xff] }
  0x44   :  { %p1001_p4 = pnand %p1000_p3, %p994_p0 }
  0x7d   :  { %v30_v10 = vpop.permute.xlu0 %29 }
  0x7e   :  { %vm31_vm3 = vcmp.eq.s32.totalorder %v24_v11, %v30_v10  ;;  %vm33_vm4 = vcmp.eq.s32.totalorder %v26_v14, %v30_v10  ;;  %vm32_vm6 = vcmp.eq.s32.totalorder %v25_v13, %v30_v10  ;;  %vm34_vm15 = vcmp.eq.s32.totalorder %v27_v17, %v30_v10 }
  0x7f   :  { %v50_v12 = vpop.permute.xlu1 %49 }
  0x80   :  { %vm52_vm10 = vcmp.eq.s32.totalorder %v25_v13, %v50_v12 }
  0x82   :  { %v38_v15 = vpop.permute.xlu0 %37 }
  0x83   :  { %vm39_vm0 = vcmp.eq.s32.totalorder %v24_v11, %v38_v15  ;;  %vm40_vm1 = vcmp.eq.s32.totalorder %v25_v13, %v38_v15  ;;  %vm41_vm2 = vcmp.eq.s32.totalorder %v26_v14, %v38_v15  ;;  %vm42_vm11 = vcmp.eq.s32.totalorder %v27_v17, %v38_v15 }
  0x84   :  { %v62_v16 = vpop.permute.xlu1 %61  ;;  %vm1250_vm5 = vmor %vm31_vm3, %vm39_vm0 }
  0x85   :  { %v1324_v18 = vsel %vm1250_vm5, 4294967295, %v1323_v18  ;;  %vm64_vm7 = vcmp.eq.s32.totalorder %v25_v13, %v62_v16  ;;  %vm1254_vm8 = vmor %vm33_vm4, %vm41_vm2  ;;  %vm66_vm0 = vcmp.eq.s32.totalorder %v27_v17, %v62_v16  ;;  %vm54_vm5 = vcmp.eq.s32.totalorder %v27_v17, %v50_v12 }
  0x86   :  { %v1326_v19 = vsel %vm1254_vm8, 4294967295, %v1325_v19  ;;  %vm44_vm9 = vmor %vm32_vm6, %vm40_vm1  ;;  %vm63_vm4 = vcmp.eq.s32.totalorder %v24_v11, %v62_v16  ;;  %vm51_vm6 = vcmp.eq.s32.totalorder %v24_v11, %v50_v12 }
  0x87   :  { %vm56_vm12 = vmor %vm44_vm9, %vm52_vm10  ;;  %vm1327_vm9 = vnez %v1324_v18 }
  0x88   :  { %vm68_vm13 = vmor %vm56_vm12, %vm64_vm7  ;;  %vm65_vm7 = vcmp.eq.s32.totalorder %v26_v14, %v62_v16 }
  0x89   :  { %vm823_vm14 = vmpackc.low %vm68_vm13, %vm68_vm13 }
  0x8a   :  { %824 = vmatprep.mubr.msk.bf16.mxu0 %vm823_vm14, %v1019_v20  ;;  %vm46_vm3 = vmor %vm34_vm15, %vm42_vm11 }
  0x8b   :  { %vm58_vm2 = vmor %vm46_vm3, %vm54_vm5  ;;  %vm53_vm5 = vcmp.eq.s32.totalorder %v26_v14, %v50_v12 }
  0x8c   :  { %vm70_vm8 = vmor %vm58_vm2, %vm66_vm0 }
  0x8d   :  { %vm827_vm1 = vmpackc.low %vm70_vm8, %vm70_vm8  ;;  %vm1328_vm8 = vnez %v1326_v19 }
  0x8e   :  { %828 = vmatprep.mubr.msk.bf16.mxu1 %vm827_vm1, %v1019_v20  ;;  %vm55_vm10 = vmor %vm1327_vm9, %vm51_vm6 }
  0x8f   :  { %vm67_vm12 = vmor %vm55_vm10, %vm63_vm4 }
  0x90   :  { %vm825_vm11 = vmpackc.low %vm67_vm12, %vm67_vm12 }
  0x91   :  { %826 = vmatmul.mubr.msk.bf16.vlgmr.msra.gmra.mxu0 %vm825_vm11, %v1019_v20  ;;  %vm57_vm13 = vmor %vm1328_vm8, %vm53_vm5 }
  0x92   :  { %vm69_vm14 = vmor %vm57_vm13, %vm65_vm7  ;;  %849 = vmatpush3.bf16.msra.mxu0 %v978_v21 }
  0x93   :  { %vm829_vm15 = vmpackc.low %vm69_vm14, %vm69_vm14  ;;  %850 = vmatprep.subr.bf16.mxu0 %v979_v22 }
  0x94   :  { %830 = vmatmul.mubr.msk.bf16.vlgmr.msra.gmra.mxu1 %vm829_vm15, %v1019_v20 }
  0x96   :  { %851 = vmatpush3.bf16.msra.mxu0 %v980_v23 }
  0x97   :  { %852 = vmatprep.subr.bf16.mxu0 %v981_v24 }
  0x9a   :  { %853 = vmatpush3.bf16.msra.mxu0 %v982_v25 }
  0x9b   :  { %854 = vmatprep.subr.bf16.mxu0 %v983_v26 }
  0x9e   :  { %855 = vmatpush3.bf16.msra.mxu0 %v984_v27 }
  0x9f   :  { %856 = vmatprep.subr.bf16.mxu0 %v985_v28 }
  0xa2   :  { %857 = vmatpush3.bf16.msra.mxu0 %v986_v29 }
  0xa3   :  { %858 = vmatprep.subr.bf16.mxu0 %v987_v30 }
  0xa6   :  { %859 = vmatpush3.bf16.msra.mxu0 %v988_v31 }
  0xa7   :  { %860 = vmatprep.subr.bf16.mxu0 %v989_v32 }
  0xaa   :  { %861 = vmatpush3.bf16.msra.mxu0 %v990_v33 }
  0xab   :  { %862 = vmatprep.subr.bf16.mxu0 %v991_v34 }
  0xae   :  { %863 = vmatpush3.bf16.msra.mxu0 %v992_v35 }
 0x151   :  { %v513_v42 = vpop.f32.mrf.mxu0 }
 0x152   :  { %v514_v43 = vadd.f32 %v513_v42, %v152_v40 }
 0x153   :  { %v515_v44 = vpop.f32.mrf.mxu0 }
 0x154   :  { %v554_v45 = vpop.f32.mrf.mxu1  ;;  %v516_v46 = vadd.f32 %v515_v44, %v156_v41 }
 0x155   :  { %v555_v47 = vadd.f32 %v554_v45, %v514_v43  ;;  %v517_v48 = vpop.f32.mrf.mxu0 }
 0x156   :  { %v556_v49 = vpop.f32.mrf.mxu1 }
 0x157   :  { %v557_v50 = vadd.f32 %v556_v49, %v516_v46  ;;  %v518_v51 = vpop.f32.mrf.mxu0  ;;  %v561_v52 = vmax.f32 %v555_v47, 0.0 }
 0x158   :  { %v558_v53 = vpop.f32.mrf.mxu1 }
 0x159   :  { %v562_v54 = vmax.f32 %v557_v50, 0.0  ;;  %v563_v57 = vpack.c.bf16 %v561_v52, %v561_v52 }
 0x15a   :  { %v559_v55 = vpop.f32.mrf.mxu1 }
 0x15b   :  { %v564_v56 = vpack.c.bf16 %v562_v54, %v562_v54 }
 0x15d   :  { %732 = vmatprep.mubr.bf16.mxu0 %v564_v56 }
 0x15e   :  { %733 = vmatmul.mubr.bf16.vlgmr.msra.gmra.mxu0 %v563_v57 }
 0x21e   :  { %v864_v58 = vpop.f32.mrf.mxu0 }
 0x220   :  { %v865_v59 = vpop.f32.mrf.mxu0 }
 0x221   :  { %v866_v61 = vadd.f32 %v865_v59, %v864_v58 }
 0x222   :  { %v867_v62 = vpop.f32.mrf.mxu0 }
 0x223   :  { %v735_v63 = vadd.f32 %v866_v61, %v831_v60 }
 0x224   :  { %v868_v0 = vpop.f32.mrf.mxu0 }
 0x225   :  { %740 = vst [vmem:[#allocation2] sm:$0xff] %v735_v63 }
 0x226   :  { %1004 = shalt.err (!%p1001_p4)
}
 0x227   :  { %750 = dma.vmem_to_hbm [thread:$0]  %s748_s25, 128, %s1322_s5, [#allocation3]  }
 0x228   :  { %1013 = dma.done.wait [#allocation3], 128  }
 0x229   :  { %1014 = vsyncadd [#allocation3], 4294967168 }
 0x22a   :  { %754 = vsyncpa [#allocation3], 1 }

</bundles_post_ra>
